<compile_context>
chip_gen: v7x
topology: tpu7x:2x2x1
jax: 0.10.0
libtpu: 0.0.40
codegen_flags: <defaults>
</compile_context>

<pallas_src>
import jax
import jax.numpy as jnp
from jax.experimental import pallas as pl
from jax.experimental.pallas import tpu as pltpu


def inv_kernel(x_ref, wfc_ref, bfc_ref, wl_ref, ws_ref, wm_ref,
               land_ref, shot_ref, move_ref):
    # x_ref: (tm, pack*F) tile of (packed) rows; weights/bias are full resident blocks.
    h = jnp.dot(x_ref[...], wfc_ref[...], preferred_element_type=jnp.float32)
    h = jnp.maximum(h + bfc_ref[...], 0.0)          # ReLU
    land_ref[...] = jnp.dot(h, wl_ref[...], preferred_element_type=jnp.float32)
    shot_ref[...] = jnp.dot(h, ws_ref[...], preferred_element_type=jnp.float32)
    move_ref[...] = jnp.dot(h, wm_ref[...], preferred_element_type=jnp.float32)


def _round_up(x, m):
    return ((x + m - 1) // m) * m


def _block_diag(w, pack):
    """(k, n) -> (pack*k, pack*n) block-diagonal replication (trace-time, tiny)."""
    if pack == 1:
        return w
    k, n = w.shape
    eye = jnp.eye(pack, dtype=w.dtype)
    return (eye[:, None, :, None] * w[None, :, None, :]).reshape(pack * k, pack * n)


def inv_forward(x, params, *, max_packed_tile=4096):
    """x: (B, S, 2*input_size) f32. Returns (land, shot, move) with last dims (2, shot_len, 2)."""
    w_fc, b_fc, w_land, w_shot, w_move = params
    B, S, F = x.shape
    H = w_fc.shape[1]
    n_land, n_shot, n_move = w_land.shape[1], w_shot.shape[1], w_move.shape[1]

    rows = B * S

    # Lane packing: put `pack` logical rows into one 128-lane vreg row. Pick the largest
    # pack in {4, 2, 1} that divides rows exactly (so no padding / slicing is ever needed).
    pack = 1
    for p in (4, 2):
        if rows % p == 0 and p * F <= 128 and p * H <= 128:
            pack = p
            break
    T = rows // pack                      # packed row count
    Fp, Hp = pack * F, pack * H

    xp = x.reshape(T, Fp)                 # free, contiguous reshape (no copy)
    wfc_p = _block_diag(w_fc, pack)       # (Fp, Hp)
    bfc_p = jnp.tile(b_fc, pack).reshape(1, Hp)
    wl_p = _block_diag(w_land, pack)      # (Hp, pack*2)
    ws_p = _block_diag(w_shot, pack)      # (Hp, pack*shot_len)
    wm_p = _block_diag(w_move, pack)      # (Hp, pack*2)

    # Row tile over packed rows: multiple of 8 (or the full extent), capped at
    # max_packed_tile (~18 MiB VMEM worst case incl. double buffering), and split into
    # >= 2 grid steps when possible so both v7x TensorCores get work.
    if T <= 8:
        tm = T
    else:
        tm = min(max_packed_tile, _round_up(pl.cdiv(T, 2), 8))
    grid = (pl.cdiv(T, tm),)              # partial tail block handled by Pallas masking

    full = lambda i: (0, 0)               # weights/bias: one resident block for all steps
    row_blk = lambda i: (i, 0)            # x / outputs: one row tile per grid step

    land_p, shot_p, move_p = pl.pallas_call(
        inv_kernel,
        out_shape=(
            jax.ShapeDtypeStruct((T, pack * n_land), jnp.float32),
            jax.ShapeDtypeStruct((T, pack * n_shot), jnp.float32),
            jax.ShapeDtypeStruct((T, pack * n_move), jnp.float32),
        ),
        grid_spec=pltpu.PrefetchScalarGridSpec(
            num_scalar_prefetch=0,
            grid=grid,
            in_specs=[
                pl.BlockSpec((tm, Fp), row_blk),            # packed x rows
                pl.BlockSpec((Fp, Hp), full),               # block-diag W_fc
                pl.BlockSpec((1, Hp), full),                # tiled b_fc
                pl.BlockSpec((Hp, pack * n_land), full),    # block-diag W_land
                pl.BlockSpec((Hp, pack * n_shot), full),    # block-diag W_shot
                pl.BlockSpec((Hp, pack * n_move), full),    # block-diag W_move
            ],
            out_specs=[
                pl.BlockSpec((tm, pack * n_land), row_blk),
                pl.BlockSpec((tm, pack * n_shot), row_blk),
                pl.BlockSpec((tm, pack * n_move), row_blk),
            ],
        ),
        compiler_params=pltpu.CompilerParams(
            dimension_semantics=("parallel",),
            vmem_limit_bytes=32 * 1024 * 1024,   # explicit budget (v5e default is 16 MiB)
        ),
    )(xp, wfc_p, bfc_p, wl_p, ws_p, wm_p)

    # Un-pack: (T, pack*n) row-major == (rows, n) row-major -> free reshapes, no copies.
    land = land_p.reshape(B, S, n_land)
    shot = shot_p.reshape(B, S, n_shot)
    move = move_p.reshape(B, S, n_move)
    return land, shot, move


def init_params(key, input_size, hidden_size, shot_type_len):
    """Deterministic synthetic parameters matching INV.__init__ shapes.
    Stored transposed: (in_features, out_features)."""
    k1, k2, k3, k4, k5 = jax.random.split(key, 5)
    fin = 2 * input_size
    w_fc = jax.random.normal(k1, (fin, hidden_size), jnp.float32) * 0.1
    b_fc = jax.random.normal(k2, (hidden_size,), jnp.float32) * 0.1
    w_land = jax.random.normal(k3, (hidden_size, 2), jnp.float32) * 0.1
    w_shot = jax.random.normal(k4, (hidden_size, shot_type_len), jnp.float32) * 0.1
    w_move = jax.random.normal(k5, (hidden_size, 2), jnp.float32) * 0.1
    return (w_fc, b_fc, w_land, w_shot, w_move)


def inv_forward_ref(x, params):
    w_fc, b_fc, w_land, w_shot, w_move = params
    h = jax.nn.relu(jnp.einsum("bsf,fh->bsh", x, w_fc) + b_fc)
    return (jnp.einsum("bsh,ho->bso", h, w_land),
            jnp.einsum("bsh,ho->bso", h, w_shot),
            jnp.einsum("bsh,ho->bso", h, w_move))


if __name__ == "__main__":
    input_size = 16       # fc input = 2*input_size = 32
    hidden_size = 32
    player_id_len = 6     # embedding tables exist in __init__ but forward() never uses them
    shot_type_len = 10

    key = jax.random.PRNGKey(0)
    kp, kx = jax.random.split(key)
    params = init_params(kp, input_size, hidden_size, shot_type_len)

    # Small canonical shape: rows = 16 (multiple of 4) -> lane-packed path, single step.
    B, S = 2, 8
    x = jax.random.normal(kx, (B, S, 2 * input_size), jnp.float32)
    land, shot, move = jax.block_until_ready(inv_forward(x, params))

    land_r, shot_r, move_r = inv_forward_ref(x, params)
    assert land.shape == (B, S, 2) and shot.shape == (B, S, shot_type_len) and move.shape == (B, S, 2)
    assert jnp.allclose(land, land_r, atol=1e-4)
    assert jnp.allclose(shot, shot_r, atol=1e-4)
    assert jnp.allclose(move, move_r, atol=1e-4)

    # Odd row count (861): pack=1 fallback, 2-step grid with a masked partial tail block.
    B2, S2 = 7, 123
    x2 = jax.random.normal(kx, (B2, S2, 2 * input_size), jnp.float32)
    o2 = jax.block_until_ready(inv_forward(x2, params))
    r2 = inv_forward_ref(x2, params)
    for a, b in zip(o2, r2):
        assert a.shape == b.shape
        assert jnp.allclose(a, b, atol=1e-4)

    # Multiple-of-4 row count (400): packed path, 2-step grid with a partial tail block.
    B3, S3 = 4, 100
    x3 = jax.random.normal(kx, (B3, S3, 2 * input_size), jnp.float32)
    o3 = jax.block_until_ready(inv_forward(x3, params))
    r3 = inv_forward_ref(x3, params)
    for a, b in zip(o3, r3):
        assert a.shape == b.shape
        assert jnp.allclose(a, b, atol=1e-4)

    print("KERNEL_OK")
</pallas_src>

<mosaic_0001>
module attributes {stable_mosaic.version = 11 : i64} {
  func.func @inv_kernel(%arg0: i32, %arg1: memref<4x128xf32, #tpu.memory_space<vmem>>, %arg2: memref<128x128xf32, #tpu.memory_space<vmem>>, %arg3: memref<1x128xf32, #tpu.memory_space<vmem>>, %arg4: memref<128x8xf32, #tpu.memory_space<vmem>>, %arg5: memref<128x40xf32, #tpu.memory_space<vmem>>, %arg6: memref<128x8xf32, #tpu.memory_space<vmem>>, %arg7: memref<4x8xf32, #tpu.memory_space<vmem>>, %arg8: memref<4x40xf32, #tpu.memory_space<vmem>>, %arg9: memref<4x8xf32, #tpu.memory_space<vmem>>) attributes {dimension_semantics = [#tpu.dimension_semantics<parallel>], iteration_bounds = array<i64: 1>, scalar_prefetch = 0 : i64, scratch_operands = 0 : i64, tpu.core_type = #tpu.core_type<tc>, window_params = [{transform_indices = @transform_0, window_bounds = array<i64: 4, 128>}, {pipeline_mode = #tpu.pipeline_mode<synchronous>, transform_indices = @transform_1, window_bounds = array<i64: 128, 128>}, {pipeline_mode = #tpu.pipeline_mode<synchronous>, transform_indices = @transform_2, window_bounds = array<i64: 1, 128>}, {pipeline_mode = #tpu.pipeline_mode<synchronous>, transform_indices = @transform_3, window_bounds = array<i64: 128, 8>}, {pipeline_mode = #tpu.pipeline_mode<synchronous>, transform_indices = @transform_4, window_bounds = array<i64: 128, 40>}, {pipeline_mode = #tpu.pipeline_mode<synchronous>, transform_indices = @transform_5, window_bounds = array<i64: 128, 8>}, {transform_indices = @transform_6, window_bounds = array<i64: 4, 8>}, {transform_indices = @transform_7, window_bounds = array<i64: 4, 40>}, {transform_indices = @transform_8, window_bounds = array<i64: 4, 8>}]} {
    %c0 = arith.constant 0 : index
    %c0_0 = arith.constant 0 : index
    %0 = vector.load %arg1[%c0, %c0_0] : memref<4x128xf32, #tpu.memory_space<vmem>>, vector<4x128xf32>
    %c0_1 = arith.constant 0 : index
    %c0_2 = arith.constant 0 : index
    %1 = vector.load %arg2[%c0_1, %c0_2] : memref<128x128xf32, #tpu.memory_space<vmem>>, vector<128x128xf32>
    %cst = arith.constant dense<0.000000e+00> : vector<4x128xf32>
    %2 = tpu.matmul %0, %1, %cst {dimension_numbers = #tpu.dot_dimension_numbers<[1], [0], [0], [1], [0, 0, 1, 1], [], []>} : vector<4x128xf32>, vector<128x128xf32>, vector<4x128xf32> -> vector<4x128xf32>
    %c0_3 = arith.constant 0 : index
    %c0_4 = arith.constant 0 : index
    %3 = vector.load %arg3[%c0_3, %c0_4] : memref<1x128xf32, #tpu.memory_space<vmem>>, vector<1x128xf32>
    %4 = vector.broadcast %3 : vector<1x128xf32> to vector<4x128xf32>
    %5 = arith.addf %2, %4 : vector<4x128xf32>
    %cst_5 = arith.constant 0.000000e+00 : f32
    %6 = vector.broadcast %cst_5 : f32 to vector<4x128xf32>
    %7 = arith.maximumf %5, %6 : vector<4x128xf32>
    %c0_6 = arith.constant 0 : index
    %c0_7 = arith.constant 0 : index
    %8 = vector.load %arg4[%c0_6, %c0_7] : memref<128x8xf32, #tpu.memory_space<vmem>>, vector<128x8xf32>
    %cst_8 = arith.constant dense<0.000000e+00> : vector<4x8xf32>
    %9 = tpu.matmul %7, %8, %cst_8 {dimension_numbers = #tpu.dot_dimension_numbers<[1], [0], [0], [1], [0, 0, 1, 1], [], []>} : vector<4x128xf32>, vector<128x8xf32>, vector<4x8xf32> -> vector<4x8xf32>
    %c0_9 = arith.constant 0 : index
    %c0_10 = arith.constant 0 : index
    %10 = vector.load %arg7[%c0_9, %c0_10] : memref<4x8xf32, #tpu.memory_space<vmem>>, vector<4x8xf32>
    tpu.vector_store %arg7[%c0_9, %c0_10], %9 {strides = array<i32>} : memref<4x8xf32, #tpu.memory_space<vmem>>, vector<4x8xf32>,
    %c0_11 = arith.constant 0 : index
    %c0_12 = arith.constant 0 : index
    %11 = vector.load %arg5[%c0_11, %c0_12] : memref<128x40xf32, #tpu.memory_space<vmem>>, vector<128x40xf32>
    %cst_13 = arith.constant dense<0.000000e+00> : vector<4x40xf32>
    %12 = tpu.matmul %7, %11, %cst_13 {dimension_numbers = #tpu.dot_dimension_numbers<[1], [0], [0], [1], [0, 0, 1, 1], [], []>} : vector<4x128xf32>, vector<128x40xf32>, vector<4x40xf32> -> vector<4x40xf32>
    %c0_14 = arith.constant 0 : index
    %c0_15 = arith.constant 0 : index
    %13 = vector.load %arg8[%c0_14, %c0_15] : memref<4x40xf32, #tpu.memory_space<vmem>>, vector<4x40xf32>
    tpu.vector_store %arg8[%c0_14, %c0_15], %12 {strides = array<i32>} : memref<4x40xf32, #tpu.memory_space<vmem>>, vector<4x40xf32>,
    %c0_16 = arith.constant 0 : index
    %c0_17 = arith.constant 0 : index
    %14 = vector.load %arg6[%c0_16, %c0_17] : memref<128x8xf32, #tpu.memory_space<vmem>>, vector<128x8xf32>
    %cst_18 = arith.constant dense<0.000000e+00> : vector<4x8xf32>
    %15 = tpu.matmul %7, %14, %cst_18 {dimension_numbers = #tpu.dot_dimension_numbers<[1], [0], [0], [1], [0, 0, 1, 1], [], []>} : vector<4x128xf32>, vector<128x8xf32>, vector<4x8xf32> -> vector<4x8xf32>
    %c0_19 = arith.constant 0 : index
    %c0_20 = arith.constant 0 : index
    %16 = vector.load %arg9[%c0_19, %c0_20] : memref<4x8xf32, #tpu.memory_space<vmem>>, vector<4x8xf32>
    tpu.vector_store %arg9[%c0_19, %c0_20], %15 {strides = array<i32>} : memref<4x8xf32, #tpu.memory_space<vmem>>, vector<4x8xf32>,
    return
  }
  func.func @transform_0(%arg0: i32) -> (i32, i32) {
    %c0_i32 = arith.constant 0 : i32
    %c0_i32_0 = arith.constant 0 : i32
    return %arg0, %c0_i32 : i32, i32
  }
  func.func @transform_1(%arg0: i32) -> (i32, i32) {
    %c0_i32 = arith.constant 0 : i32
    %c0_i32_0 = arith.constant 0 : i32
    %c0_i32_1 = arith.constant 0 : i32
    return %c0_i32, %c0_i32_0 : i32, i32
  }
  func.func @transform_2(%arg0: i32) -> (i32, i32) {
    %c0_i32 = arith.constant 0 : i32
    %c0_i32_0 = arith.constant 0 : i32
    %c0_i32_1 = arith.constant 0 : i32
    return %c0_i32, %c0_i32_0 : i32, i32
  }
  func.func @transform_3(%arg0: i32) -> (i32, i32) {
    %c0_i32 = arith.constant 0 : i32
    %c0_i32_0 = arith.constant 0 : i32
    %c0_i32_1 = arith.constant 0 : i32
    return %c0_i32, %c0_i32_0 : i32, i32
  }
  func.func @transform_4(%arg0: i32) -> (i32, i32) {
    %c0_i32 = arith.constant 0 : i32
    %c0_i32_0 = arith.constant 0 : i32
    %c0_i32_1 = arith.constant 0 : i32
    return %c0_i32, %c0_i32_0 : i32, i32
  }
  func.func @transform_5(%arg0: i32) -> (i32, i32) {
    %c0_i32 = arith.constant 0 : i32
    %c0_i32_0 = arith.constant 0 : i32
    %c0_i32_1 = arith.constant 0 : i32
    return %c0_i32, %c0_i32_0 : i32, i32
  }
  func.func @transform_6(%arg0: i32) -> (i32, i32) {
    %c0_i32 = arith.constant 0 : i32
    %c0_i32_0 = arith.constant 0 : i32
    return %arg0, %c0_i32 : i32, i32
  }
  func.func @transform_7(%arg0: i32) -> (i32, i32) {
    %c0_i32 = arith.constant 0 : i32
    %c0_i32_0 = arith.constant 0 : i32
    return %arg0, %c0_i32 : i32, i32
  }
  func.func @transform_8(%arg0: i32) -> (i32, i32) {
    %c0_i32 = arith.constant 0 : i32
    %c0_i32_0 = arith.constant 0 : i32
    return %arg0, %c0_i32 : i32, i32
  }
}

</mosaic_0001>

<bundles_post_ra>
// kernel: tpu_custom_call.1
= control target key start
LH: loop header
LB: loop body
LE: loop exit
PB: predicated region body
PF: predicated region fallthrough
CT: control target
= control target key end

     0   :  { %14 = vsyncpa [#allocation3], 0  ;;  %v808_v3 = vmov 0.0|0.0   ;;  %vm809_vm0 = vmmov 0   ;;  %v810_v6 = vmov 0.0   ;;  %s1142_s0 = inlined_call_operand.vmem [shape: f32[4,128], index: 0, kind: input, shape index: {}]   ;;  %s1143_s1 = inlined_call_operand.vmem [shape: f32[128,128], index: 1, kind: input, shape index: {}]   ;;  %s1144_s2 = inlined_call_operand.vmem [shape: f32[1,128], index: 2, kind: input, shape index: {}]   ;;  %s1145_s3 = inlined_call_operand.vmem [shape: f32[128,8], index: 3, kind: input, shape index: {}]   ;;  %s1146_s4 = inlined_call_operand.vmem [shape: f32[128,40], index: 4, kind: input, shape index: {}]   ;;  %s1147_s5 = inlined_call_operand.vmem [shape: f32[128,8], index: 5, kind: input, shape index: {}]   ;;  %s1148_s6 = inlined_call_operand.hbm [shape: f32[4,8], index: 6, kind: output, shape index: {0}]   ;;  %s1149_s7 = inlined_call_operand.hbm [shape: f32[4,40], index: 7, kind: output, shape index: {1}]   ;;  %s1150_s8 = inlined_call_operand.hbm [shape: f32[4,8], index: 8, kind: output, shape index: {2}]  }
   0x1   :  { %v29_v0 = vld [vmem:[%s1143_s1] sm:$0xff]  ;;  %v30_v1 = vld [vmem:[%s1143_s1 + $0x8] sm:$0xff]  ;;  %v31_v2 = vld [vmem:[%s1143_s1 + $0x10] sm:$0xff]  ;;  %636 = vmatprep.subr.bf16.mxu0 %v808_v3  ;;  %528 = vmatprep.mubr.msk.f32.mxu0 %vm809_vm0, %v810_v6 }
   0x2   :  { %v637_v4 = vpack.c.bf16 %v30_v1, %v29_v0  ;;  %v32_v5 = vld [vmem:[%s1143_s1 + $0x18] sm:$0xff]  ;;  %660 = vmatprep.subr.bf16.mxu1 %v808_v3  ;;  %563 = vmatprep.mubr.msk.f32.mxu1 %vm809_vm0, %v810_v6  ;;  %v33_v8 = vld [vmem:[%s1143_s1 + $0x20] sm:$0xff]  ;;  %v34_v9 = vld [vmem:[%s1143_s1 + $0x28] sm:$0xff] }
   0x3   :  { %v640_v7 = vpack.c.bf16 %v32_v5, %v31_v2  ;;  %v123_v10 = vld [vmem:[%s1145_s3] sm:$0xff]  ;;  %v124_v11 = vld [vmem:[%s1145_s3 + $0x8] sm:$0xff]  ;;  %v643_v12 = vpack.c.bf16 %v34_v9, %v33_v8  ;;  %v125_v14 = vld [vmem:[%s1145_s3 + $0x10] sm:$0xff] }
   0x4   :  { %638 = vmatpush3.bf16.msra.mxu0 %v637_v4  ;;  %v661_v13 = vpack.c.bf16 %v124_v11, %v123_v10  ;;  %v126_v15 = vld [vmem:[%s1145_s3 + $0x18] sm:$0xff]  ;;  %v35_v16 = vld [vmem:[%s1143_s1 + $0x30] sm:$0xff]  ;;  %v127_v19 = vld [vmem:[%s1145_s3 + $0x20] sm:$0xff] }
   0x5   :  { %639 = vmatprep.subr.bf16.mxu0 %v808_v3  ;;  %v36_v17 = vld [vmem:[%s1143_s1 + $0x38] sm:$0xff]  ;;  %v664_v18 = vpack.c.bf16 %v126_v15, %v125_v14  ;;  %v128_v20 = vld [vmem:[%s1145_s3 + $0x28] sm:$0xff]  ;;  %v37_v22 = vld [vmem:[%s1143_s1 + $0x40] sm:$0xff] }
   0x6   :  { %662 = vmatpush3.bf16.msra.mxu1 %v661_v13  ;;  %v646_v21 = vpack.c.bf16 %v36_v17, %v35_v16  ;;  %v38_v23 = vld [vmem:[%s1143_s1 + $0x48] sm:$0xff]  ;;  %v667_v24 = vpack.c.bf16 %v128_v20, %v127_v19  ;;  %v129_v25 = vld [vmem:[%s1145_s3 + $0x30] sm:$0xff]  ;;  %v130_v26 = vld [vmem:[%s1145_s3 + $0x38] sm:$0xff] }
   0x7   :  { %663 = vmatprep.subr.bf16.mxu1 %v808_v3  ;;  %v649_v27 = vpack.c.bf16 %v38_v23, %v37_v22 }
   0x8   :  { %641 = vmatpush3.bf16.msra.mxu0 %v640_v7 }
   0x9   :  { %642 = vmatprep.subr.bf16.mxu0 %v808_v3 }
   0xa   :  { %665 = vmatpush3.bf16.msra.mxu1 %v664_v18 }
   0xb   :  { %666 = vmatprep.subr.bf16.mxu1 %v808_v3 }
   0xc   :  { %644 = vmatpush3.bf16.msra.mxu0 %v643_v12 }
   0xd   :  { %645 = vmatprep.subr.bf16.mxu0 %v808_v3 }
  0x10   :  { %647 = vmatpush3.bf16.msra.mxu0 %v646_v21 }
  0x11   :  { %15 = vsyncpa [#allocation5], 0  ;;  %648 = vmatprep.subr.bf16.mxu0 %v808_v3  ;;  %v39_v28 = vld [vmem:[%s1143_s1 + $0x50] sm:$0xff]  ;;  %v40_v29 = vld [vmem:[%s1143_s1 + $0x58] sm:$0xff]  ;;  %668 = vmatpush3.bf16.msra.mxu1 %v667_v24  ;;  %v670_v30 = vpack.c.bf16 %v130_v26, %v129_v25  ;;  %s811_s16 = smov [#allocation4]   ;;  %s812_s18 = smov [#allocation2]  }
  0x12   :  { %669 = vmatprep.subr.bf16.mxu1 %v808_v3  ;;  %v131_v31 = vld [vmem:[%s1145_s3 + $0x40] sm:$0xff]  ;;  %v132_v32 = vld [vmem:[%s1145_s3 + $0x48] sm:$0xff]  ;;  %v652_v33 = vpack.c.bf16 %v40_v29, %v39_v28  ;;  %v133_v37 = vld [vmem:[%s1145_s3 + $0x50] sm:$0xff]  ;;  %s402_s17 = sshll.u32 %s811_s16, 4  ;;  %vm297_vm1 = vcmask 322560   ;;  %vm209_vm2 = vcmask 60416   ;;  %s403_s17 = int_to_ptr.vmem [resolvable:$true] %s402_s17 }
  0x13   :  { %v41_v34 = vld [vmem:[%s1143_s1 + $0x60] sm:$0xff]  ;;  %v42_v35 = vld [vmem:[%s1143_s1 + $0x68] sm:$0xff]  ;;  %v673_v36 = vpack.c.bf16 %v132_v32, %v131_v31  ;;  %v134_v38 = vld [vmem:[%s1145_s3 + $0x58] sm:$0xff]  ;;  %p743_p1 = scmp.lt.s32.totalorder %s403_s17, %s403_s17 }
  0x14   :  { %650 = vmatpush3.bf16.msra.mxu0 %v649_v27  ;;  %v655_v39 = vpack.c.bf16 %v42_v35, %v41_v34  ;;  %v43_v40 = vld [vmem:[%s1143_s1 + $0x70] sm:$0xff]  ;;  %v44_v41 = vld [vmem:[%s1143_s1 + $0x78] sm:$0xff]  ;;  %v676_v42 = vpack.c.bf16 %v134_v38, %v133_v37  ;;  %v135_v43 = vld [vmem:[%s1145_s3 + $0x60] sm:$0xff] }
  0x15   :  { %651 = vmatprep.subr.bf16.mxu0 %v808_v3  ;;  %671 = vmatpush3.bf16.msra.mxu1 %v670_v30  ;;  %v136_v44 = vld [vmem:[%s1145_s3 + $0x68] sm:$0xff]  ;;  %v658_v45 = vpack.c.bf16 %v44_v41, %v43_v40  ;;  %v211_v46 = vld [vmem:[%s1146_s4] sm:$0xff]  ;;  %v213_v51 = vld [vmem:[%s1146_s4 + $0x10] sm:$0xff] }
  0x16   :  { %672 = vmatprep.subr.bf16.mxu1 %v808_v3  ;;  %v212_v47 = vld [vmem:[%s1146_s4 + $0x8] sm:$0xff]  ;;  %v679_v48 = vpack.c.bf16 %v136_v44, %v135_v43  ;;  %v28_v49 = vld [vmem:[%s1142_s0] sm:$0xf]  ;;  %v214_v52 = vld [vmem:[%s1146_s4 + $0x18] sm:$0xff] }
  0x17   :  { %v685_v50 = vpack.c.bf16 %v212_v47, %v211_v46  ;;  %v688_v53 = vpack.c.bf16 %v214_v52, %v213_v51  ;;  %v215_v54 = vld [vmem:[%s1146_s4 + $0x20] sm:$0xff]  ;;  %v216_v55 = vld [vmem:[%s1146_s4 + $0x28] sm:$0xff]  ;;  %v217_v57 = vld [vmem:[%s1146_s4 + $0x30] sm:$0xff] }
  0x18   :  { %653 = vmatpush3.bf16.msra.mxu0 %v652_v33  ;;  %v691_v56 = vpack.c.bf16 %v216_v55, %v215_v54  ;;  %v218_v58 = vld [vmem:[%s1146_s4 + $0x38] sm:$0xff]  ;;  %v219_v60 = vld [vmem:[%s1146_s4 + $0x40] sm:$0xff]  ;;  %v220_v61 = vld [vmem:[%s1146_s4 + $0x48] sm:$0xff] }
  0x19   :  { %654 = vmatprep.subr.bf16.mxu0 %v808_v3  ;;  %674 = vmatpush3.bf16.msra.mxu1 %v673_v36  ;;  %v694_v59 = vpack.c.bf16 %v218_v58, %v217_v57  ;;  %v697_v62 = vpack.c.bf16 %v220_v61, %v219_v60  ;;  %v221_v63 = vld [vmem:[%s1146_s4 + $0x50] sm:$0xff]  ;;  %v222_v0 = vld [vmem:[%s1146_s4 + $0x58] sm:$0xff]  ;;  %v223_v2 = vld [vmem:[%s1146_s4 + $0x60] sm:$0xff] }
  0x1a   :  { %675 = vmatprep.subr.bf16.mxu1 %v808_v3  ;;  %v700_v1 = vpack.c.bf16 %v222_v0, %v221_v63  ;;  %v224_v4 = vld [vmem:[%s1146_s4 + $0x68] sm:$0xff]  ;;  %v137_v7 = vld [vmem:[%s1145_s3 + $0x70] sm:$0xff]  ;;  %v138_v8 = vld [vmem:[%s1145_s3 + $0x78] sm:$0xff] }
  0x1b   :  { %v703_v5 = vpack.c.bf16 %v224_v4, %v223_v2  ;;  %v682_v9 = vpack.c.bf16 %v138_v8, %v137_v7  ;;  %v225_v10 = vld [vmem:[%s1146_s4 + $0x70] sm:$0xff]  ;;  %v226_v11 = vld [vmem:[%s1146_s4 + $0x78] sm:$0xff]  ;;  %v427_v13 = vld [vmem:[%s1144_s2] ss:$0 sm:$0xff]  ;;  %s392_s2 = sshll.u32 %s812_s18, 4  ;;  %s1097_s2 = int_to_ptr.vmem [resolvable:$true] %s392_s2 }
  0x1c   :  { %656 = vmatpush3.bf16.msra.mxu0 %v655_v39  ;;  %v706_v12 = vpack.c.bf16 %v226_v11, %v225_v10  ;;  %v299_v14 = vld [vmem:[%s1147_s5] sm:$0xff]  ;;  %v300_v15 = vld [vmem:[%s1147_s5 + $0x8] sm:$0xff]  ;;  %v301_v21 = vld [vmem:[%s1147_s5 + $0x10] sm:$0xff] }
  0x1d   :  { %657 = vmatprep.subr.bf16.mxu0 %v808_v3  ;;  %677 = vmatpush3.bf16.msra.mxu1 %v676_v42  ;;  %v709_v19 = vpack.c.bf16 %v300_v15, %v299_v14  ;;  %v302_v22 = vld [vmem:[%s1147_s5 + $0x18] sm:$0xff]  ;;  %v303_v24 = vld [vmem:[%s1147_s5 + $0x20] sm:$0xff]  ;;  %v304_v25 = vld [vmem:[%s1147_s5 + $0x28] sm:$0xff] }
  0x1e   :  { %678 = vmatprep.subr.bf16.mxu1 %v808_v3  ;;  %v712_v23 = vpack.c.bf16 %v302_v22, %v301_v21  ;;  %v715_v26 = vpack.c.bf16 %v304_v25, %v303_v24  ;;  %v305_v27 = vld [vmem:[%s1147_s5 + $0x30] sm:$0xff]  ;;  %v307_v29 = vld [vmem:[%s1147_s5 + $0x40] sm:$0xff]  ;;  %v308_v30 = vld [vmem:[%s1147_s5 + $0x48] sm:$0xff] }
  0x1f   :  { %v721_v31 = vpack.c.bf16 %v308_v30, %v307_v29  ;;  %v309_v32 = vld [vmem:[%s1147_s5 + $0x50] sm:$0xff]  ;;  %v310_v33 = vld [vmem:[%s1147_s5 + $0x58] sm:$0xff]  ;;  %v311_v35 = vld [vmem:[%s1147_s5 + $0x60] sm:$0xff] }
  0x20   :  { %659 = vmatpush3.bf16.msra.mxu0 %v658_v45  ;;  %v724_v34 = vpack.c.bf16 %v310_v33, %v309_v32  ;;  %v312_v36 = vld [vmem:[%s1147_s5 + $0x68] sm:$0xff]  ;;  %v313_v38 = vld [vmem:[%s1147_s5 + $0x70] sm:$0xff]  ;;  %v314_v39 = vld [vmem:[%s1147_s5 + $0x78] sm:$0xff] }
  0x21   :  { %684 = vmatprep.subr.bf16.mxu0 %v808_v3  ;;  %680 = vmatpush3.bf16.msra.mxu1 %v679_v48  ;;  %v727_v37 = vpack.c.bf16 %v312_v36, %v311_v35  ;;  %v730_v40 = vpack.c.bf16 %v314_v39, %v313_v38 }
  0x22   :  { %681 = vmatprep.subr.bf16.mxu1 %v808_v3 }
  0x23   :  { %529 = vmatmul.mubr.f32.vlgmr.msra.gmra.mrb[0].mxu0 %v28_v49 }
  0x24   :  { %686 = vmatpush3.bf16.msra.mxu0 %v685_v50  ;;  %598 = vmatprep.mubr.msk.f32.mxu0 %vm809_vm0, %v810_v6 }
  0x25   :  { %687 = vmatprep.subr.bf16.mxu0 %v808_v3  ;;  %683 = vmatpush3.bf16.msra.mxu1 %v682_v9 }
  0x26   :  { %708 = vmatprep.subr.bf16.mxu1 %v808_v3 }
  0x28   :  { %689 = vmatpush3.bf16.msra.mxu0 %v688_v53 }
  0x29   :  { %690 = vmatprep.subr.bf16.mxu0 %v808_v3 }
  0x2c   :  { %692 = vmatpush3.bf16.msra.mxu0 %v691_v56 }
  0x2d   :  { %693 = vmatprep.subr.bf16.mxu0 %v808_v3 }
  0x30   :  { %695 = vmatpush3.bf16.msra.mxu0 %v694_v59 }
  0x31   :  { %696 = vmatprep.subr.bf16.mxu0 %v808_v3 }
  0x34   :  { %698 = vmatpush3.bf16.msra.mxu0 %v697_v62 }
  0x35   :  { %699 = vmatprep.subr.bf16.mxu0 %v808_v3 }
  0x38   :  { %701 = vmatpush3.bf16.msra.mxu0 %v700_v1 }
  0x39   :  { %702 = vmatprep.subr.bf16.mxu0 %v808_v3 }
  0x3c   :  { %704 = vmatpush3.bf16.msra.mxu0 %v703_v5 }
  0x3d   :  { %705 = vmatprep.subr.bf16.mxu0 %v808_v3 }
  0x40   :  { %707 = vmatpush3.bf16.msra.mxu0 %v706_v12 }
  0xf6   :  { %v118_v16 = vpop.f32.mrb[0].mxu0 }
  0xf7   :  { %v119_v17 = vadd.f32 %v427_v13, %v118_v16  ;;  %v530_v18 = vpop.f32.mrb[1].mxu0 }
  0xf9   :  { %v122_v20 = vmax.f32 %v119_v17, 0.0 }
  0xfb   :  { %564 = vmatmul.mubr.f32.vlgmr.msra.gmra.mrb[0].mxu1 %v122_v20  ;;  %599 = vmatmul.mubr.f32.vlgmr.msra.gmra.mrb[2].mxu0 %v122_v20 }
  0xfc   :  { %710 = vmatpush3.bf16.msra.mxu1 %v709_v19  ;;  %633 = vmatprep.mubr.msk.f32.mxu1 %vm809_vm0, %v810_v6  ;;  %v306_v6 = vld [vmem:[%s1147_s5 + $0x38] sm:$0xff]  ;;  %s738_s5 = scalar_lea.vmem %s403_s17, 64 }
  0xfd   :  { %711 = vmatprep.subr.bf16.mxu1 %v808_v3  ;;  %v718_v28 = vpack.c.bf16 %v306_v6, %v305_v27  ;;  %p739_p0 = scmp.ne.s32.totalorder %s403_s17, %s738_s5  ;;  %p744_p2 = scmp.lt.s32.totalorder %s738_s5, %s738_s5 }
  0xff   :  { %p745_p3 = por %p744_p2, %p743_p1 }
 0x100   :  { %713 = vmatpush3.bf16.msra.mxu1 %v712_v23 }
 0x101   :  { %714 = vmatprep.subr.bf16.mxu1 %v808_v3  ;;  %p746_p4 = pnand %p745_p3, %p739_p0 }
 0x104   :  { %716 = vmatpush3.bf16.msra.mxu1 %v715_v26 }
 0x105   :  { %717 = vmatprep.subr.bf16.mxu1 %v808_v3 }
 0x108   :  { %719 = vmatpush3.bf16.msra.mxu1 %v718_v28 }
 0x109   :  { %720 = vmatprep.subr.bf16.mxu1 %v808_v3 }
 0x10c   :  { %722 = vmatpush3.bf16.msra.mxu1 %v721_v31 }
 0x10d   :  { %723 = vmatprep.subr.bf16.mxu1 %v808_v3 }
 0x110   :  { %725 = vmatpush3.bf16.msra.mxu1 %v724_v34 }
 0x111   :  { %726 = vmatprep.subr.bf16.mxu1 %v808_v3 }
 0x114   :  { %728 = vmatpush3.bf16.msra.mxu1 %v727_v37 }
 0x115   :  { %729 = vmatprep.subr.bf16.mxu1 %v808_v3 }
 0x118   :  { %731 = vmatpush3.bf16.msra.mxu1 %v730_v40 }
 0x11b   :  { %634 = vmatmul.mubr.f32.vlgmr.msra.gmra.mrb[2].mxu1 %v122_v20 }
 0x1ce   :  { %v205_v41 = vpop.f32.mrb[0].mxu1  ;;  %v293_v42 = vpop.f32.mrb[2].mxu0 }
 0x1cf   :  { %298 = vst.msk [vmem:[#allocation4] sm:$0xf] %vm297_vm1, %v293_v42  ;;  %v565_v43 = vpop.f32.mrb[1].mxu1  ;;  %v600_v44 = vpop.f32.mrb[3].mxu0 }
 0x1d0   :  { %210 = vst.msk [vmem:[#allocation2] sm:$0xf] %vm209_vm2, %v205_v41 }
 0x1d1   :  { %749 = shalt.err (!%p746_p4)
}
 0x1d2   :  { %s750_s21 = scalar_lea.hbm %s1149_s7, 64 }
 0x1d3   :  { %p751_p5 = scmp.ne.s32.totalorder %s1149_s7, %s750_s21  ;;  %p754_p6 = scmp.lt.u32.totalorder %s750_s21, %s1149_s7 }
 0x1d5   :  { %p756_p7 = pnand %p754_p6, %p751_p5 }
 0x1d7   :  { %759 = shalt.err (!%p756_p7)
}
 0x1d8   :  { %405 = dma.vmem_to_hbm [thread:$0]  %s403_s17, 64, %s1149_s7, [#allocation5]  }
 0x1d9   :  { %s760_s27 = scalar_lea.vmem %s1097_s2, 64  ;;  %p765_p9 = scmp.lt.s32.totalorder %s1097_s2, %s1097_s2 }
 0x1da   :  { %p761_p8 = scmp.ne.s32.totalorder %s1097_s2, %s760_s27  ;;  %p766_p10 = scmp.lt.s32.totalorder %s760_s27, %s760_s27 }
 0x1dc   :  { %p767_p11 = por %p766_p10, %p765_p9 }
 0x1de   :  { %p768_p12 = pnand %p767_p11, %p761_p8 }
 0x1e0   :  { %771 = shalt.err (!%p768_p12)
}
 0x1e1   :  { %s772_s0 = scalar_lea.hbm %s1148_s6, 64 }
 0x1e2   :  { %p773_p13 = scmp.ne.s32.totalorder %s1148_s6, %s772_s0  ;;  %p776_p0 = scmp.lt.u32.totalorder %s772_s0, %s1148_s6 }
 0x1e4   :  { %p778_p1 = pnand %p776_p0, %p773_p13 }
 0x1e6   :  { %781 = shalt.err (!%p778_p1)
}
 0x1e7   :  { %395 = dma.vmem_to_hbm [thread:$0]  %s1097_s2, 64, %s1148_s6, [#allocation3]  }
 0x1e8   :  { %s813_s13 = smov [#allocation6]  }
 0x1e9   :  { %s412_s3 = sshll.u32 %s813_s13, 4  ;;  %s413_s3 = int_to_ptr.vmem [resolvable:$true] %s412_s3 }
 0x1ea   :  { %s782_s14 = scalar_lea.vmem %s413_s3, 64  ;;  %p787_p3 = scmp.lt.s32.totalorder %s413_s3, %s413_s3 }
 0x1eb   :  { %p783_p2 = scmp.ne.s32.totalorder %s413_s3, %s782_s14  ;;  %p788_p4 = scmp.lt.s32.totalorder %s782_s14, %s782_s14 }
 0x1ed   :  { %p789_p5 = por %p788_p4, %p787_p3 }
 0x1ee   :  { %v381_v3 = vpop.f32.mrb[2].mxu1 }
 0x1ef   :  { %385 = vst.msk [vmem:[#allocation6] sm:$0xf] %vm209_vm2, %v381_v3  ;;  %v635_v45 = vpop.f32.mrb[3].mxu1  ;;  %p790_p6 = pnand %p789_p5, %p783_p2 }
 0x1f1   :  { %793 = shalt.err (!%p790_p6)
}
 0x1f2   :  { %s794_s16 = scalar_lea.hbm %s1150_s8, 64 }
 0x1f3   :  { %p795_p7 = scmp.ne.s32.totalorder %s1150_s8, %s794_s16  ;;  %p798_p8 = scmp.lt.u32.totalorder %s794_s16, %s1150_s8 }
 0x1f5   :  { %p800_p9 = pnand %p798_p8, %p795_p7 }
 0x1f7   :  { %803 = shalt.err (!%p800_p9)
}
 0x1f8   :  { %415 = dma.vmem_to_hbm [thread:$0]  %s413_s3, 64, %s1150_s8, [#allocation5]  }
 0x1f9   :  { %804 = dma.done.wait [#allocation3], 64  }
 0x1fa   :  { %805 = vsyncadd [#allocation3], 4294967232 }
 0x1fb   :  { %806 = dma.done.wait [#allocation5], 128  }
 0x1fc   :  { %807 = vsyncadd [#allocation5], 4294967168 }
 0x1fd   :  { %425 = vsyncpa [#allocation3], 1 }
 0x1fe   :  { %426 = vsyncpa [#allocation5], 1 }

</bundles_post_ra>
